<compile_context>
chip_gen: v5e
topology: v5e:2x2
jax: 0.10.0
libtpu: 0.0.40
codegen_flags: <defaults>
</compile_context>

<pallas_src>
import jax
import jax.numpy as jnp
from jax.experimental import pallas as pl
from jax.experimental.pallas import tpu as pltpu


def _round_up(x: int, m: int) -> int:
    return ((x + m - 1) // m) * m


def _pad2d(a, rows, cols):
    r, c = a.shape
    if (r, c) == (rows, cols):
        return a
    return jnp.zeros((rows, cols), a.dtype).at[:r, :c].set(a)


def _vmem_capacity_bytes() -> int:
    """Generation-aware VMEM capacity (128 MiB v5e/v6e, 64 MiB v7x)."""
    try:
        cap = getattr(pltpu.get_tpu_info(), "vmem_capacity_bytes", None)
        if cap:
            return int(cap)
    except Exception:
        pass
    return 64 * 1024 * 1024  # conservative default (v7x)


def _select_tiling(B, clp, dp, vmem_cap):
    """Pick (tm, tn, w1_buffer_count, vmem_budget) so the working set fits.

    Prefers the largest B-tile (fewer W2T re-streams from HBM), then the
    widest output tile (tn == clp collapses the j axis entirely when it fits).
    """
    usable = int(vmem_cap * 0.85)            # leave headroom for Mosaic internals
    resident = clp * dp * 2                  # W1T (bf16), grid-invariant
    # Single-buffer large grid-invariant operands: they are never re-fetched
    # mid-sweep, so double-buffering only wastes VMEM.
    w1_bufs = 1 if resident > (8 << 20) else 2

    bp16 = _round_up(max(B, 16), 16)
    if bp16 <= 512:
        tm_cands = [bp16] + [t for t in (256, 128) if t < bp16]
    else:
        tm_cands = [512, 256, 128]
    tn_cands = []
    for t in (clp, 4096, 2048, 1024, 512, 256, 128):
        if t <= clp and clp % t == 0 and t not in tn_cands:
            tn_cands.append(t)

    def vmem_bytes(tm, tn):
        return (2 * tm * clp * 2             # x tile (bf16, double-buffered)
                + w1_bufs * resident         # W1T (bf16, resident)
                + w1_bufs * 8 * dp * 4       # b1 (f32, 8-sublane padded)
                + 2 * dp * tn * 2            # W2T tile (bf16, streamed)
                + 2 * 8 * tn * 4             # b2 tile (f32)
                + 2 * tm * tn * 4            # output tile (f32)
                + tm * dp * 2)               # h scratch (bf16)

    for tm in tm_cands:
        for tn in tn_cands:
            if vmem_bytes(tm, tn) <= usable:
                return tm, tn, w1_bufs, vmem_bytes(tm, tn)
    tm, tn = tm_cands[-1], tn_cands[-1]
    return tm, tn, w1_bufs, vmem_bytes(tm, tn)


def dense_head_kernel(x_ref, w1_ref, b1_ref, w2_ref, b2_ref, o_ref, h_ref):
    # Grid = (B-tile i ["parallel"], output-tile j ["arbitrary", innermost]).
    # The hidden activation h is computed once per B-tile (j == 0) and cached
    # in a bf16 VMEM scratch, reused by every subsequent output tile.
    # NOTE: this caching is only correct because j is the innermost grid axis
    # and is marked "arbitrary" — do not reorder the grid or mark j "parallel".
    j = pl.program_id(1)

    @pl.when(j == 0)
    def _():
        h = jnp.dot(x_ref[...], w1_ref[...],
                    preferred_element_type=jnp.float32)   # bf16 x bf16 -> f32
        h = jnp.maximum(h + b1_ref[...], 0.0)             # f32 bias + ReLU
        h_ref[...] = h.astype(jnp.bfloat16)               # cast once, cache bf16

    # TODO(synk): training-mode dropout (pltpu.prng_random_bits mask) not
    # implemented; kernel matches the PyTorch module in eval mode.
    out = jnp.dot(h_ref[...], w2_ref[...],
                  preferred_element_type=jnp.float32)      # bf16 x bf16 -> f32
    o_ref[...] = (out + b2_ref[...]).astype(o_ref.dtype)   # f32 bias epilogue


def prepare_params(w1t, b1, w2t, b2):
    """One-time pad/cast of the Linear weights to MXU-friendly bf16 layouts.

    Hoisted out of the forward path so each call does not spend an extra HBM
    pass re-reading (f32) and re-writing (bf16) the weights.
    """
    cl, d = w1t.shape
    clp = _round_up(cl, 128)
    dp = _round_up(d, 128)
    return {
        "w1": _pad2d(w1t.astype(jnp.bfloat16), clp, dp),
        "b1": _pad2d(b1.astype(jnp.float32)[None, :], 1, dp),
        "w2": _pad2d(w2t.astype(jnp.bfloat16), dp, clp),
        "b2": _pad2d(b2.astype(jnp.float32)[None, :], 1, clp),
        "cl": cl, "d": d, "clp": clp, "dp": dp,
    }


def dense_head_forward(x, params, channels, length):
    """x: (B, C, L) float32; params from prepare_params.  Returns (B, C, L) f32."""
    B = x.shape[0]
    cl = channels * length
    assert params["cl"] == cl, "params were prepared for a different C*L"
    clp, dp = params["clp"], params["dp"]
    w1_p, b1_p, w2_p, b2_p = params["w1"], params["b1"], params["w2"], params["b2"]

    vmem_cap = _vmem_capacity_bytes()
    tm, tn, w1_bufs, budget = _select_tiling(B, clp, dp, vmem_cap)
    bp = _round_up(B, tm)
    nb, nj = bp // tm, clp // tn

    # Only x changes per call: cast to bf16 and pad only if actually needed.
    x_flat = x.reshape(B, cl).astype(jnp.bfloat16)
    if (bp, clp) == (B, cl):
        x_p = x_flat
    else:
        x_p = jnp.zeros((bp, clp), jnp.bfloat16).at[:B, :cl].set(x_flat)

    # Grid-invariant operands: single-buffer when large (no pipelining to lose).
    resident_kwargs = {}
    if w1_bufs == 1:
        resident_kwargs = dict(pipeline_mode=pl.Buffered(buffer_count=1))

    # Exact budget + small headroom for Mosaic internals (no double hedging).
    vmem_limit = min(max(budget + (4 << 20), 32 << 20), vmem_cap)

    flops = 4 * bp * clp * dp  # two (bp x clp x dp)-class matmuls
    bytes_accessed = (bp * clp * 2            # x (bf16)
                      + clp * dp * 2          # W1T, fetched once (resident)
                      + nb * dp * clp * 2     # W2T re-streamed per B-tile
                      + dp * 4 + nb * clp * 4  # biases
                      + bp * clp * 4)         # f32 output

    # TODO(synk): on v7x with a single B-tile the second TensorCore idles; a
    # leading size-2 "parallel" core-split of the j range (redundant h per core)
    # would recover it, at the cost of one extra first-matmul per core.
    out_p = pl.pallas_call(
        dense_head_kernel,
        out_shape=jax.ShapeDtypeStruct((bp, clp), jnp.float32),
        grid_spec=pltpu.PrefetchScalarGridSpec(
            num_scalar_prefetch=0,
            grid=(nb, nj),
            in_specs=[
                pl.BlockSpec((tm, clp), lambda i, j: (i, 0)),   # x: full-K row block
                pl.BlockSpec((clp, dp), lambda i, j: (0, 0),    # W1T: VMEM-resident
                             **resident_kwargs),
                pl.BlockSpec((1, dp), lambda i, j: (0, 0),      # b1: resident
                             **resident_kwargs),
                pl.BlockSpec((dp, tn), lambda i, j: (0, j)),    # W2T: streamed tiles
                pl.BlockSpec((1, tn), lambda i, j: (0, j)),     # b2: streamed tiles
            ],
            out_specs=pl.BlockSpec((tm, tn), lambda i, j: (i, j)),
            scratch_shapes=[pltpu.VMEM((tm, dp), jnp.bfloat16)],  # cached hidden h
        ),
        compiler_params=pltpu.CompilerParams(
            dimension_semantics=("parallel", "arbitrary"),
            vmem_limit_bytes=vmem_limit,
        ),
        cost_estimate=pl.CostEstimate(
            flops=flops, transcendentals=0, bytes_accessed=bytes_accessed),
    )(x_p, w1_p, b1_p, w2_p, b2_p)

    return out_p[:B, :cl].reshape(B, channels, length)


def init_params(key, channels, length, dense_dim, dtype=jnp.float32):
    """Deterministic init mimicking nn.Linear's uniform(-1/sqrt(fan_in), ...)."""
    cl = channels * length
    k1, k2, k3, k4 = jax.random.split(key, 4)
    bound1 = 1.0 / jnp.sqrt(cl)
    bound2 = 1.0 / jnp.sqrt(dense_dim)
    # Stored already transposed relative to PyTorch's (out, in) convention.
    w1t = jax.random.uniform(k1, (cl, dense_dim), dtype, -bound1, bound1)
    b1 = jax.random.uniform(k2, (dense_dim,), dtype, -bound1, bound1)
    w2t = jax.random.uniform(k3, (dense_dim, cl), dtype, -bound2, bound2)
    b2 = jax.random.uniform(k4, (cl,), dtype, -bound2, bound2)
    return w1t, b1, w2t, b2


def reference_forward(x, w1t, b1, w2t, b2, channels, length):
    """Pure-JAX reference mirroring the kernel's bf16-operand / f32-acc path."""
    B = x.shape[0]
    xf = x.reshape(B, channels * length).astype(jnp.bfloat16)
    h = jnp.dot(xf, w1t.astype(jnp.bfloat16),
                preferred_element_type=jnp.float32) + b1.astype(jnp.float32)
    h = jnp.maximum(h, 0.0).astype(jnp.bfloat16)
    out = jnp.dot(h, w2t.astype(jnp.bfloat16),
                  preferred_element_type=jnp.float32) + b2.astype(jnp.float32)
    return out.reshape(B, channels, length)


if __name__ == "__main__":
    B, C, L, D = 2, 4, 16, 32
    key = jax.random.PRNGKey(0)
    kx, kp = jax.random.split(key)
    x = jax.random.normal(kx, (B, C, L), dtype=jnp.float32)
    w1t, b1, w2t, b2 = init_params(kp, C, L, D)

    params = prepare_params(w1t, b1, w2t, b2)     # one-time pad/cast (hoisted)
    out = dense_head_forward(x, params, C, L)
    out = jax.block_until_ready(out)

    ref = reference_forward(x, w1t, b1, w2t, b2, C, L)
    assert out.shape == (B, C, L)
    assert jnp.allclose(out, ref, atol=1e-3, rtol=1e-3), (
        float(jnp.max(jnp.abs(out - ref))))

    print("KERNEL_OK")
</pallas_src>

<mosaic_0001>
module attributes {stable_mosaic.version = 11 : i64} {
  func.func @dense_head_kernel(%arg0: i32, %arg1: i32, %arg2: memref<16x128xbf16, #tpu.memory_space<vmem>>, %arg3: memref<128x128xbf16, #tpu.memory_space<vmem>>, %arg4: memref<1x128xf32, #tpu.memory_space<vmem>>, %arg5: memref<128x128xbf16, #tpu.memory_space<vmem>>, %arg6: memref<1x128xf32, #tpu.memory_space<vmem>>, %arg7: memref<16x128xf32, #tpu.memory_space<vmem>>, %arg8: memref<16x128xbf16, #tpu.memory_space<vmem>>) attributes {dimension_semantics = [#tpu.dimension_semantics<parallel>, #tpu.dimension_semantics<arbitrary>], iteration_bounds = array<i64: 1, 1>, scalar_prefetch = 0 : i64, scratch_operands = 1 : i64, tpu.core_type = #tpu.core_type<tc>, window_params = [{transform_indices = @transform_0, window_bounds = array<i64: 16, 128>}, {pipeline_mode = #tpu.pipeline_mode<synchronous>, transform_indices = @transform_1, window_bounds = array<i64: 128, 128>}, {pipeline_mode = #tpu.pipeline_mode<synchronous>, transform_indices = @transform_2, window_bounds = array<i64: 1, 128>}, {transform_indices = @transform_3, window_bounds = array<i64: 128, 128>}, {transform_indices = @transform_4, window_bounds = array<i64: 1, 128>}, {transform_indices = @transform_5, window_bounds = array<i64: 16, 128>}]} {
    %c0_i32 = arith.constant 0 : i32
    %0 = arith.cmpi eq, %arg1, %c0_i32 : i32
    %1 = arith.extui %0 : i1 to i32
    %c0_i32_0 = arith.constant 0 : i32
    %2 = arith.cmpi ne, %1, %c0_i32_0 : i32
    scf.if %2 {
      %c0_8 = arith.constant 0 : index
      %c0_9 = arith.constant 0 : index
      %10 = vector.load %arg2[%c0_8, %c0_9] : memref<16x128xbf16, #tpu.memory_space<vmem>>, vector<16x128xbf16>
      %c0_10 = arith.constant 0 : index
      %c0_11 = arith.constant 0 : index
      %11 = vector.load %arg3[%c0_10, %c0_11] : memref<128x128xbf16, #tpu.memory_space<vmem>>, vector<128x128xbf16>
      %cst_12 = arith.constant dense<0.000000e+00> : vector<16x128xf32>
      %12 = tpu.matmul %10, %11, %cst_12 {dimension_numbers = #tpu.dot_dimension_numbers<[1], [0], [0], [1], [0, 0, 1, 1], [], []>} : vector<16x128xbf16>, vector<128x128xbf16>, vector<16x128xf32> -> vector<16x128xf32>
      %c0_13 = arith.constant 0 : index
      %c0_14 = arith.constant 0 : index
      %13 = vector.load %arg4[%c0_13, %c0_14] : memref<1x128xf32, #tpu.memory_space<vmem>>, vector<1x128xf32>
      %14 = vector.broadcast %13 : vector<1x128xf32> to vector<16x128xf32>
      %15 = arith.addf %12, %14 : vector<16x128xf32>
      %cst_15 = arith.constant 0.000000e+00 : f32
      %16 = vector.broadcast %cst_15 : f32 to vector<16x128xf32>
      %17 = arith.maximumf %15, %16 : vector<16x128xf32>
      %18 = arith.truncf %17 : vector<16x128xf32> to vector<16x128xbf16>
      %c0_16 = arith.constant 0 : index
      %c0_17 = arith.constant 0 : index
      %19 = vector.load %arg8[%c0_16, %c0_17] : memref<16x128xbf16, #tpu.memory_space<vmem>>, vector<16x128xbf16>
      tpu.vector_store %arg8[%c0_16, %c0_17], %18 {strides = array<i32>} : memref<16x128xbf16, #tpu.memory_space<vmem>>, vector<16x128xbf16>,
    } else {
    }
    %c0 = arith.constant 0 : index
    %c0_1 = arith.constant 0 : index
    %3 = vector.load %arg8[%c0, %c0_1] : memref<16x128xbf16, #tpu.memory_space<vmem>>, vector<16x128xbf16>
    %c0_2 = arith.constant 0 : index
    %c0_3 = arith.constant 0 : index
    %4 = vector.load %arg5[%c0_2, %c0_3] : memref<128x128xbf16, #tpu.memory_space<vmem>>, vector<128x128xbf16>
    %cst = arith.constant dense<0.000000e+00> : vector<16x128xf32>
    %5 = tpu.matmul %3, %4, %cst {dimension_numbers = #tpu.dot_dimension_numbers<[1], [0], [0], [1], [0, 0, 1, 1], [], []>} : vector<16x128xbf16>, vector<128x128xbf16>, vector<16x128xf32> -> vector<16x128xf32>
    %c0_4 = arith.constant 0 : index
    %c0_5 = arith.constant 0 : index
    %6 = vector.load %arg6[%c0_4, %c0_5] : memref<1x128xf32, #tpu.memory_space<vmem>>, vector<1x128xf32>
    %7 = vector.broadcast %6 : vector<1x128xf32> to vector<16x128xf32>
    %8 = arith.addf %5, %7 : vector<16x128xf32>
    %c0_6 = arith.constant 0 : index
    %c0_7 = arith.constant 0 : index
    %9 = vector.load %arg7[%c0_6, %c0_7] : memref<16x128xf32, #tpu.memory_space<vmem>>, vector<16x128xf32>
    tpu.vector_store %arg7[%c0_6, %c0_7], %8 {strides = array<i32>} : memref<16x128xf32, #tpu.memory_space<vmem>>, vector<16x128xf32>,
    return
  }
  func.func @transform_0(%arg0: i32, %arg1: i32) -> (i32, i32) {
    %c0_i32 = arith.constant 0 : i32
    %c0_i32_0 = arith.constant 0 : i32
    return %arg0, %c0_i32 : i32, i32
  }
  func.func @transform_1(%arg0: i32, %arg1: i32) -> (i32, i32) {
    %c0_i32 = arith.constant 0 : i32
    %c0_i32_0 = arith.constant 0 : i32
    %c0_i32_1 = arith.constant 0 : i32
    return %c0_i32, %c0_i32_0 : i32, i32
  }
  func.func @transform_2(%arg0: i32, %arg1: i32) -> (i32, i32) {
    %c0_i32 = arith.constant 0 : i32
    %c0_i32_0 = arith.constant 0 : i32
    %c0_i32_1 = arith.constant 0 : i32
    return %c0_i32, %c0_i32_0 : i32, i32
  }
  func.func @transform_3(%arg0: i32, %arg1: i32) -> (i32, i32) {
    %c0_i32 = arith.constant 0 : i32
    %c0_i32_0 = arith.constant 0 : i32
    return %c0_i32, %arg1 : i32, i32
  }
  func.func @transform_4(%arg0: i32, %arg1: i32) -> (i32, i32) {
    %c0_i32 = arith.constant 0 : i32
    %c0_i32_0 = arith.constant 0 : i32
    return %c0_i32, %arg1 : i32, i32
  }
  func.func @transform_5(%arg0: i32, %arg1: i32) -> (i32, i32) {
    %c0_i32 = arith.constant 0 : i32
    return %arg0, %arg1 : i32, i32
  }
}

</mosaic_0001>

<bundles_post_ra>
// kernel: tpu_custom_call.1
= control target key start
LH: loop header
LB: loop body
LE: loop exit
PB: predicated region body
PF: predicated region fallthrough
CT: control target
= control target key end

     0   :  { %10 = vsyncpa [#allocation4], 0  ;;  %s543_s0 = inlined_call_operand.hbm [shape: bf16[16,128], index: 0, kind: input, shape index: {}]   ;;  %s544_s1 = inlined_call_operand.hbm [shape: bf16[128,128], index: 1, kind: input, shape index: {}]   ;;  %s545_s2 = inlined_call_operand.vmem [shape: f32[1,128], index: 2, kind: input, shape index: {}]   ;;  %s546_s3 = inlined_call_operand.hbm [shape: bf16[128,128], index: 3, kind: input, shape index: {}]   ;;  %s547_s4 = inlined_call_operand.vmem [shape: f32[1,128], index: 4, kind: input, shape index: {}]   ;;  %s548_s5 = inlined_call_operand.hbm [shape: f32[16,128], index: 5, kind: output, shape index: {}]  }
   0x1   :  { %11 = vsyncpa [#allocation7], 0 }
   0x2   :  { %12 = vsyncpa [#allocation5], 0  ;;  %s30_s20 = sshll.u32 %s544_s1, 4  ;;  %s487_s21 = smov [#allocation6]   ;;  %s31_s20 = int_to_ptr.hbm [resolvable:$true] %s30_s20 }
   0x3   :  { %s32_s22 = sshll.u32 %s487_s21, 4  ;;  %s17_s25 = sshll.u32 %s543_s0, 4  ;;  %s33_s22 = int_to_ptr.vmem [resolvable:$true] %s32_s22  ;;  %s18_s25 = int_to_ptr.hbm [resolvable:$true] %s17_s25 }
   0x4   :  { %s488_s26 = smov 64   ;;  %s489_s27 = smov 4  }
   0x5   :  { %38 = dma.hbm_to_vmem [thread:$0]  %s31_s20, 1024, %s33_s22, [#allocation7], %s488_s26, %s488_s26, %s489_s27  }
   0x6   :  { %s490_s28 = smov [#allocation3]   ;;  %s45_s7 = sshll.u32 %s546_s3, 4  ;;  %s46_s7 = int_to_ptr.hbm [resolvable:$true] %s45_s7 }
   0x7   :  { %s19_s29 = sshll.u32 %s490_s28, 4  ;;  %s491_s1 = smov [#allocation8]   ;;  %s20_s29 = int_to_ptr.vmem [resolvable:$true] %s19_s29 }
   0x8   :  { %25 = dma.hbm_to_vmem [thread:$0]  %s18_s25, 128, %s20_s29, [#allocation4], %s488_s26, %s488_s26, %s489_s27  }
   0x9   :  { %s47_s8 = sshll.u32 %s491_s1, 4  ;;  %s48_s8 = int_to_ptr.vmem [resolvable:$true] %s47_s8 }
   0xa   :  { %53 = dma.hbm_to_vmem [thread:$0]  %s46_s7, 1024, %s48_s8, [#allocation7], %s488_s26, %s488_s26, %s489_s27  }
   0xb   :  { %481 = dma.done.wait [#allocation4], 128  }
   0xc   :  { %482 = vsyncadd [#allocation4], 4294967168 }
   0xd   :  { %483 = dma.done.wait [#allocation7], 2048  }
   0xe   :  { %484 = vsyncadd [#allocation7], 4294965248  ;;  %v360_v0 = vld [vmem:[#allocation6 + $0x38] sm:$0xff]  ;;  %v359_v1 = vld [vmem:[#allocation6 + $0x30] sm:$0xff]  ;;  %s492_s11 = smov [#allocation9]   ;;  %s266_s14 = sshll.u32 %s548_s5, 4  ;;  %s267_s14 = int_to_ptr.hbm [resolvable:$true] %s266_s14 }
   0xf   :  { %148 = vmatpush.bf16.msra.mxu0 %v360_v0  ;;  %v369_v2 = vld [vmem:[#allocation8 + $0x38] sm:$0xff]  ;;  %v368_v3 = vld [vmem:[#allocation8 + $0x30] sm:$0xff]  ;;  %v358_v4 = vld [vmem:[#allocation6 + $0x28] sm:$0xff]  ;;  %s264_s12 = sshll.u32 %s492_s11, 4  ;;  %s493_s15 = smov 128   ;;  %s265_s12 = int_to_ptr.vmem [resolvable:$true] %s264_s12 }
  0x10   :  { %244 = vmatpush.bf16.msra.mxu1 %v369_v2  ;;  %v357_v5 = vld [vmem:[#allocation6 + $0x20] sm:$0xff]  ;;  %v356_v6 = vld [vmem:[#allocation6 + $0x18] sm:$0xff]  ;;  %v355_v7 = vld [vmem:[#allocation6 + $0x10] sm:$0xff]  ;;  %s494_s16 = smov 8  }
  0x11   :  { %v354_v8 = vld [vmem:[#allocation6 + $0x8] sm:$0xff]  ;;  %v353_v9 = vld [vmem:[#allocation6] sm:$0xff]  ;;  %v352_v10 = vld [vmem:[#allocation3] sm:$0xff] }
  0x12   :  { %v367_v11 = vld [vmem:[#allocation8 + $0x28] sm:$0xff]  ;;  %v366_v12 = vld [vmem:[#allocation8 + $0x20] sm:$0xff]  ;;  %v365_v13 = vld [vmem:[#allocation8 + $0x18] sm:$0xff] }
  0x13   :  { %149 = vmatpush.bf16.msra.mxu0 %v359_v1  ;;  %v364_v14 = vld [vmem:[#allocation8 + $0x10] sm:$0xff]  ;;  %v363_v15 = vld [vmem:[#allocation8 + $0x8] sm:$0xff]  ;;  %v362_v16 = vld [vmem:[#allocation8] sm:$0xff] }
  0x14   :  { %245 = vmatpush.bf16.msra.mxu1 %v368_v3  ;;  %v383_v18 = vld [vmem:[%s545_s2] ss:$0 sm:$0xff] }
  0x15   :  { %v384_v26 = vld [vmem:[%s547_s4] ss:$0 sm:$0xff] }
  0x17   :  { %150 = vmatpush.bf16.msra.mxu0 %v358_v4 }
  0x18   :  { %246 = vmatpush.bf16.msra.mxu1 %v367_v11 }
  0x1b   :  { %151 = vmatpush.bf16.msra.mxu0 %v357_v5 }
  0x1c   :  { %247 = vmatpush.bf16.msra.mxu1 %v366_v12 }
  0x1f   :  { %152 = vmatpush.bf16.msra.mxu0 %v356_v6 }
  0x20   :  { %248 = vmatpush.bf16.msra.mxu1 %v365_v13 }
  0x23   :  { %153 = vmatpush.bf16.msra.mxu0 %v355_v7 }
  0x24   :  { %249 = vmatpush.bf16.msra.mxu1 %v364_v14 }
  0x27   :  { %154 = vmatpush.bf16.msra.mxu0 %v354_v8 }
  0x28   :  { %250 = vmatpush.bf16.msra.mxu1 %v363_v15 }
  0x2b   :  { %155 = vmatpush.bf16.msra.mxu0 %v353_v9 }
  0x2c   :  { %251 = vmatpush.bf16.msra.mxu1 %v362_v16 }
  0x2e   :  { %156 = vmatmul.bf16.vlgmr.msra.gmra.mxu0 %v352_v10 }
  0xab   :  { %v157_v17 = vpop.f32.mrf.mxu0 }
  0xac   :  { %v158_v19 = vadd.f32 %v383_v18, %v157_v17 }
  0xae   :  { %v162_v22 = vmax.f32 %v158_v19, 0.0 }
  0xb3   :  { %v159_v20 = vpop.f32.mrf.mxu0 }
  0xb4   :  { %v160_v21 = vadd.f32 %v383_v18, %v159_v20 }
  0xb6   :  { %v163_v23 = vmax.f32 %v160_v21, 0.0 }
  0xb8   :  { %v373_v24 = vpack.c.bf16 %v163_v23, %v162_v22 }
  0xba   :  { %374 = vst [vmem:[#allocation2] sm:$0xff] %v373_v24  }
  0xc1   :  { %v361_v25 = vld [vmem:[#allocation2] sm:$0xff] }
  0xc2   :  { %252 = vmatmul.bf16.vlgmr.msra.gmra.mxu1 %v361_v25 }
 0x13f   :  { %v253_v27 = vpop.f32.mrf.mxu1 }
 0x140   :  { %v254_v28 = vadd.f32 %v384_v26, %v253_v27 }
 0x142   :  { %258 = vst [vmem:[#allocation9] sm:$0xff] %v254_v28 }
 0x147   :  { %v255_v29 = vpop.f32.mrf.mxu1 }
 0x148   :  { %v256_v30 = vadd.f32 %v384_v26, %v255_v29 }
 0x14a   :  { %259 = vst [vmem:[#allocation9 + $0x8] sm:$0xff] %v256_v30 }
 0x14b   :  { %272 = dma.vmem_to_hbm [thread:$0]  %s265_s12, 256, %s267_s14, [#allocation5], %s493_s15, %s493_s15, %s494_s16  }
 0x14c   :  { %485 = dma.done.wait [#allocation5], 256  }
 0x14d   :  { %486 = vsyncadd [#allocation5], 4294967040 }
 0x14e   :  { %277 = vsyncpa [#allocation4], 1 }
 0x14f   :  { %278 = vsyncpa [#allocation7], 1 }
 0x150   :  { %279 = vsyncpa [#allocation5], 1 }

</bundles_post_ra>
